<compile_context>
chip_gen: v7x
topology: tpu7x:2x2x1
jax: 0.10.0
libtpu: 0.0.40
codegen_flags: <defaults>
</compile_context>

<pallas_src>
import jax
import jax.numpy as jnp
from jax.experimental import pallas as pl
from jax.experimental.pallas import tpu as pltpu


# ----------------------------------------------------------------------------
# Kernel: fused fc_1 -> fc_2 -> ELU on one row tile.  Weights stay resident in
# VMEM (constant index maps); only the x / out row tiles stream per grid step.
# ----------------------------------------------------------------------------
def _mlp_encoder_kernel(x_ref, w1t_ref, b1_ref, w2t_ref, b2_ref, o_ref):
    # fc_1: MXU matmul in the operand dtype (bf16-native on v5e/v6e/v7x),
    # f32 accumulate; bias add in f32.
    h = jnp.dot(x_ref[...], w1t_ref[...],
                preferred_element_type=jnp.float32) + b1_ref[...]      # (bm, H) f32
    # fc_2: feed the hidden activation to the MXU in the weight dtype
    # (no-op for f32 weights, bf16 MXU path for bf16 weights).
    y = jnp.dot(h.astype(w2t_ref.dtype), w2t_ref[...],
                preferred_element_type=jnp.float32) + b2_ref[...]      # (bm, E) f32
    # ELU(alpha=1) in f32.  Negative branch = expm1(y), emulated without an
    # expm1 lowering: exact exp(t)-1 away from zero, 2nd-order Taylor where
    # exp(t)-1 would suffer cancellation (|t| < 2^-9).
    t = jnp.minimum(y, 0.0)
    neg = jnp.where(t > -0.001953125, t + 0.5 * t * t, jnp.exp(t) - 1.0)
    o_ref[...] = jnp.where(y > 0.0, y, neg).astype(o_ref.dtype)


# ----------------------------------------------------------------------------
# One-time parameter preparation (cache the result; do NOT call per forward).
# ----------------------------------------------------------------------------
def prepare_params(w1, b1, w2, b2, param_dtype=None):
    """w1: (H, D), b1: (H,), w2: (E, H), b2: (E,) in PyTorch nn.Linear layout.

    Weights are transposed once to lane-dense (fan_in, fan_out) layout and
    optionally cast (e.g. bf16 for the MXU-native path).  Biases are kept f32:
    the bias add and the ELU epilogue run in f32 inside the kernel.
    """
    if param_dtype is not None:
        w1 = jnp.asarray(w1).astype(param_dtype)
        w2 = jnp.asarray(w2).astype(param_dtype)
    w1t = jnp.asarray(w1).T                               # (D, H)
    w2t = jnp.asarray(w2).T                               # (H, E)
    b1r = jnp.asarray(b1, jnp.float32).reshape(1, -1)     # (1, H)
    b2r = jnp.asarray(b2, jnp.float32).reshape(1, -1)     # (1, E)
    return w1t, b1r, w2t, b2r


def _round_up(n, m):
    return -(-n // m) * m


def _pick_block_m(M, D, H, E, act_bytes, block_m):
    """Row tile size.

    * Tiny M: one full-array block (no grid-step overhead at all).
    * Otherwise: at least two row tiles so the "parallel" grid axis can be
      sharded across v7x's two TensorCores, capped at block_m and shrunk if
      the double-buffered activation tiles + f32 intermediates would crowd
      VMEM (weights/biases are resident on top of this budget).
    """
    if M <= 64:
        return M
    bm = min(block_m, _round_up(-(-M // 2), 8))
    budget = 16 * 1024 * 1024

    def tile_bytes(b):
        return 2 * b * (D + E) * act_bytes + b * (H + E) * 4

    while bm > 256 and tile_bytes(bm) > budget:
        bm = _round_up(bm // 2, 8)
    return bm


# ----------------------------------------------------------------------------
# Forward: x with arbitrary leading dims (..., input_dim); params from
# prepare_params().  Output dtype == input dtype (PyTorch semantics).
# ----------------------------------------------------------------------------
def mlp_encoder_forward(x, w1t, b1r, w2t, b2r, *, block_m=1024):
    D, H = w1t.shape
    E = w2t.shape[1]
    lead_shape = x.shape[:-1]

    x2 = x.reshape(-1, D)                 # metadata-only row-major reshape
    M = x2.shape[0]

    bm = _pick_block_m(M, D, H, E, x2.dtype.itemsize, block_m)
    grid = (pl.cdiv(M, bm),)              # ragged last row tile handled by Pallas

    out = pl.pallas_call(
        _mlp_encoder_kernel,
        out_shape=jax.ShapeDtypeStruct((M, E), x.dtype),
        grid=grid,
        in_specs=[
            pl.BlockSpec((bm, D), lambda i: (i, 0)),      # x row tile (streams)
            pl.BlockSpec((D, H), lambda i: (0, 0)),       # W1^T, resident
            pl.BlockSpec((1, H), lambda i: (0, 0)),       # b1 (f32)
            pl.BlockSpec((H, E), lambda i: (0, 0)),       # W2^T, resident
            pl.BlockSpec((1, E), lambda i: (0, 0)),       # b2 (f32)
        ],
        out_specs=pl.BlockSpec((bm, E), lambda i: (i, 0)),
        compiler_params=pltpu.CompilerParams(
            dimension_semantics=("parallel",)),           # row tiles independent
    )(x2, w1t, b1r, w2t, b2r)

    return out.reshape(*lead_shape, E)


# ----------------------------------------------------------------------------
# Deterministic parameter init (PyTorch nn.Linear default U(-1/sqrt(fan_in),.)).
# ----------------------------------------------------------------------------
def init_params(key, input_dim, hidden_dim, encoder_dim):
    k1, k2, k3, k4 = jax.random.split(key, 4)
    bnd1 = 1.0 / (input_dim ** 0.5)
    bnd2 = 1.0 / (hidden_dim ** 0.5)
    w1 = jax.random.uniform(k1, (hidden_dim, input_dim), jnp.float32, -bnd1, bnd1)
    b1 = jax.random.uniform(k2, (hidden_dim,), jnp.float32, -bnd1, bnd1)
    w2 = jax.random.uniform(k3, (encoder_dim, hidden_dim), jnp.float32, -bnd2, bnd2)
    b2 = jax.random.uniform(k4, (encoder_dim,), jnp.float32, -bnd2, bnd2)
    return w1, b1, w2, b2


# ----------------------------------------------------------------------------
# Pure-JAX reference (F.elu uses expm1 on the negative branch).
# ----------------------------------------------------------------------------
def _ref_forward(x, w1, b1, w2, b2):
    h = x @ w1.T + b1
    y = h @ w2.T + b2
    return jnp.where(y > 0.0, y, jnp.expm1(jnp.minimum(y, 0.0)))


if __name__ == "__main__":
    input_dim, hidden_dim, encoder_dim = 16, 32, 8
    batch, seq = 4, 8

    root = jax.random.PRNGKey(0)
    k_x, k_p, k_x2 = jax.random.split(root, 3)
    x = jax.random.normal(k_x, (batch, seq, input_dim), jnp.float32)
    w1, b1, w2, b2 = init_params(k_p, input_dim, hidden_dim, encoder_dim)

    fwd = jax.jit(mlp_encoder_forward)

    # --- f32 path, single-block grid (matches PyTorch f32 semantics) ---------
    p32 = prepare_params(w1, b1, w2, b2)                   # prepared once, reused
    out = jax.block_until_ready(fwd(x, *p32))
    assert out.shape == (batch, seq, encoder_dim)
    assert out.dtype == x.dtype
    ref = _ref_forward(x, w1, b1, w2, b2)
    assert jnp.allclose(out, ref, rtol=1e-5, atol=1e-5), "mismatch (f32, small)"

    # --- f32 path, multi-tile grid with a ragged last tile (no host pad) -----
    x_big = jax.random.normal(k_x2, (1043, input_dim), jnp.float32)
    out_big = jax.block_until_ready(fwd(x_big, *p32))
    assert out_big.shape == (1043, encoder_dim)
    ref_big = _ref_forward(x_big, w1, b1, w2, b2)
    assert jnp.allclose(out_big, ref_big, rtol=1e-5, atol=1e-5), "mismatch (f32, tiled)"

    # --- bf16 path: bf16 activations/weights, f32 accumulate, bf16 output ----
    pbf = prepare_params(w1, b1, w2, b2, param_dtype=jnp.bfloat16)
    x_bf = x.astype(jnp.bfloat16)
    out_bf = jax.block_until_ready(fwd(x_bf, *pbf))
    assert out_bf.shape == (batch, seq, encoder_dim)
    assert out_bf.dtype == jnp.bfloat16
    ref_bf = _ref_forward(x_bf.astype(jnp.float32),
                          w1.astype(jnp.bfloat16).astype(jnp.float32), b1,
                          w2.astype(jnp.bfloat16).astype(jnp.float32), b2)
    assert jnp.allclose(out_bf.astype(jnp.float32), ref_bf,
                        rtol=6e-2, atol=6e-2), "mismatch (bf16)"

    print("KERNEL_OK")
</pallas_src>

<mosaic_0001>
module attributes {stable_mosaic.version = 11 : i64} {
  func.func @_mlp_encoder_kernel(%arg0: i32, %arg1: memref<32x16xf32, #tpu.memory_space<vmem>>, %arg2: memref<16x32xf32, #tpu.memory_space<vmem>>, %arg3: memref<1x32xf32, #tpu.memory_space<vmem>>, %arg4: memref<32x8xf32, #tpu.memory_space<vmem>>, %arg5: memref<1x8xf32, #tpu.memory_space<vmem>>, %arg6: memref<32x8xf32, #tpu.memory_space<vmem>>) attributes {dimension_semantics = [#tpu.dimension_semantics<parallel>], iteration_bounds = array<i64: 1>, scalar_prefetch = 0 : i64, scratch_operands = 0 : i64, tpu.core_type = #tpu.core_type<tc>, window_params = [{transform_indices = @transform_0, window_bounds = array<i64: 32, 16>}, {pipeline_mode = #tpu.pipeline_mode<synchronous>, transform_indices = @transform_1, window_bounds = array<i64: 16, 32>}, {pipeline_mode = #tpu.pipeline_mode<synchronous>, transform_indices = @transform_2, window_bounds = array<i64: 1, 32>}, {pipeline_mode = #tpu.pipeline_mode<synchronous>, transform_indices = @transform_3, window_bounds = array<i64: 32, 8>}, {pipeline_mode = #tpu.pipeline_mode<synchronous>, transform_indices = @transform_4, window_bounds = array<i64: 1, 8>}, {transform_indices = @transform_5, window_bounds = array<i64: 32, 8>}]} {
    %c0 = arith.constant 0 : index
    %c0_0 = arith.constant 0 : index
    %0 = vector.load %arg1[%c0, %c0_0] : memref<32x16xf32, #tpu.memory_space<vmem>>, vector<32x16xf32>
    %c0_1 = arith.constant 0 : index
    %c0_2 = arith.constant 0 : index
    %1 = vector.load %arg2[%c0_1, %c0_2] : memref<16x32xf32, #tpu.memory_space<vmem>>, vector<16x32xf32>
    %cst = arith.constant dense<0.000000e+00> : vector<32x32xf32>
    %2 = tpu.matmul %0, %1, %cst {dimension_numbers = #tpu.dot_dimension_numbers<[1], [0], [0], [1], [0, 0, 1, 1], [], []>} : vector<32x16xf32>, vector<16x32xf32>, vector<32x32xf32> -> vector<32x32xf32>
    %c0_3 = arith.constant 0 : index
    %c0_4 = arith.constant 0 : index
    %3 = vector.load %arg3[%c0_3, %c0_4] : memref<1x32xf32, #tpu.memory_space<vmem>>, vector<1x32xf32>
    %4 = vector.broadcast %3 : vector<1x32xf32> to vector<32x32xf32>
    %5 = arith.addf %2, %4 : vector<32x32xf32>
    %c0_5 = arith.constant 0 : index
    %c0_6 = arith.constant 0 : index
    %6 = vector.load %arg4[%c0_5, %c0_6] : memref<32x8xf32, #tpu.memory_space<vmem>>, vector<32x8xf32>
    %cst_7 = arith.constant dense<0.000000e+00> : vector<32x8xf32>
    %7 = tpu.matmul %5, %6, %cst_7 {dimension_numbers = #tpu.dot_dimension_numbers<[1], [0], [0], [1], [0, 0, 1, 1], [], []>} : vector<32x32xf32>, vector<32x8xf32>, vector<32x8xf32> -> vector<32x8xf32>
    %c0_8 = arith.constant 0 : index
    %c0_9 = arith.constant 0 : index
    %8 = vector.load %arg5[%c0_8, %c0_9] : memref<1x8xf32, #tpu.memory_space<vmem>>, vector<1x8xf32>
    %9 = vector.broadcast %8 : vector<1x8xf32> to vector<32x8xf32>
    %10 = arith.addf %7, %9 : vector<32x8xf32>
    %cst_10 = arith.constant 0.000000e+00 : f32
    %11 = vector.broadcast %cst_10 : f32 to vector<32x8xf32>
    %12 = arith.minimumf %10, %11 : vector<32x8xf32>
    %cst_11 = arith.constant -0.001953125 : f32
    %13 = vector.broadcast %cst_11 : f32 to vector<32x8xf32>
    %14 = arith.cmpf ogt, %12, %13 : vector<32x8xf32>
    %cst_12 = arith.constant 5.000000e-01 : f32
    %15 = vector.broadcast %cst_12 : f32 to vector<32x8xf32>
    %16 = arith.mulf %15, %12 : vector<32x8xf32>
    %17 = arith.mulf %16, %12 : vector<32x8xf32>
    %18 = arith.addf %12, %17 : vector<32x8xf32>
    %19 = math.exp %12 : vector<32x8xf32>
    %cst_13 = arith.constant 1.000000e+00 : f32
    %20 = vector.broadcast %cst_13 : f32 to vector<32x8xf32>
    %21 = arith.subf %19, %20 : vector<32x8xf32>
    %22 = arith.select %14, %18, %21 : vector<32x8xi1>, vector<32x8xf32>
    %cst_14 = arith.constant 0.000000e+00 : f32
    %23 = vector.broadcast %cst_14 : f32 to vector<32x8xf32>
    %24 = arith.cmpf ogt, %10, %23 : vector<32x8xf32>
    %25 = arith.select %24, %10, %22 : vector<32x8xi1>, vector<32x8xf32>
    %c0_15 = arith.constant 0 : index
    %c0_16 = arith.constant 0 : index
    %26 = vector.load %arg6[%c0_15, %c0_16] : memref<32x8xf32, #tpu.memory_space<vmem>>, vector<32x8xf32>
    tpu.vector_store %arg6[%c0_15, %c0_16], %25 {strides = array<i32>} : memref<32x8xf32, #tpu.memory_space<vmem>>, vector<32x8xf32>,
    return
  }
  func.func @transform_0(%arg0: i32) -> (i32, i32) {
    %c0_i32 = arith.constant 0 : i32
    %c0_i32_0 = arith.constant 0 : i32
    return %arg0, %c0_i32 : i32, i32
  }
  func.func @transform_1(%arg0: i32) -> (i32, i32) {
    %c0_i32 = arith.constant 0 : i32
    %c0_i32_0 = arith.constant 0 : i32
    %c0_i32_1 = arith.constant 0 : i32
    return %c0_i32, %c0_i32_0 : i32, i32
  }
  func.func @transform_2(%arg0: i32) -> (i32, i32) {
    %c0_i32 = arith.constant 0 : i32
    %c0_i32_0 = arith.constant 0 : i32
    %c0_i32_1 = arith.constant 0 : i32
    return %c0_i32, %c0_i32_0 : i32, i32
  }
  func.func @transform_3(%arg0: i32) -> (i32, i32) {
    %c0_i32 = arith.constant 0 : i32
    %c0_i32_0 = arith.constant 0 : i32
    %c0_i32_1 = arith.constant 0 : i32
    return %c0_i32, %c0_i32_0 : i32, i32
  }
  func.func @transform_4(%arg0: i32) -> (i32, i32) {
    %c0_i32 = arith.constant 0 : i32
    %c0_i32_0 = arith.constant 0 : i32
    %c0_i32_1 = arith.constant 0 : i32
    return %c0_i32, %c0_i32_0 : i32, i32
  }
  func.func @transform_5(%arg0: i32) -> (i32, i32) {
    %c0_i32 = arith.constant 0 : i32
    %c0_i32_0 = arith.constant 0 : i32
    return %arg0, %c0_i32 : i32, i32
  }
}

</mosaic_0001>

<bundles_post_ra>
// kernel: mlp_encoder_forward.1
= control target key start
LH: loop header
LB: loop body
LE: loop exit
PB: predicated region body
PF: predicated region fallthrough
CT: control target
= control target key end

     0   :  { %10 = vsyncpa [#allocation3], 0  ;;  %s547_s0 = inlined_call_operand.vmem [shape: f32[32,16], index: 0, kind: input, shape index: {}]   ;;  %s548_s1 = inlined_call_operand.hbm [shape: f32[16,32], index: 1, kind: input, shape index: {}]   ;;  %s549_s2 = inlined_call_operand.vmem [shape: f32[1,32], index: 2, kind: input, shape index: {}]   ;;  %s550_s3 = inlined_call_operand.vmem [shape: f32[32,8], index: 3, kind: input, shape index: {}]   ;;  %s551_s4 = inlined_call_operand.vmem [shape: f32[1,8], index: 4, kind: input, shape index: {}]   ;;  %s552_s5 = inlined_call_operand.hbm [shape: f32[32,8], index: 5, kind: output, shape index: {}]  }
   0x1   :  { %11 = vsyncpa [#allocation4], 0  ;;  %s445_s18 = smov [#allocation2]   ;;  %s397_s22 = scalar_lea.hbm %s548_s1, 256 }
   0x2   :  { %s19_s19 = sshll.u32 %s445_s18, 4  ;;  %p398_p0 = scmp.ne.s32.totalorder %s548_s1, %s397_s22  ;;  %s20_s19 = int_to_ptr.vmem [resolvable:$true] %s19_s19 }
   0x3   :  { %p401_p1 = scmp.lt.u32.totalorder %s397_s22, %s548_s1 }
   0x5   :  { %p403_p2 = pnand %p401_p1, %p398_p0 }
   0x7   :  { %406 = shalt.err (!%p403_p2)
}
   0x8   :  { %s407_s27 = scalar_lea.vmem %s20_s19, 256  ;;  %p412_p4 = scmp.lt.s32.totalorder %s20_s19, %s20_s19 }
   0x9   :  { %p408_p3 = scmp.ne.s32.totalorder %s20_s19, %s407_s27  ;;  %p413_p5 = scmp.lt.s32.totalorder %s407_s27, %s407_s27 }
   0xb   :  { %p414_p6 = por %p413_p5, %p412_p4 }
   0xd   :  { %p415_p7 = pnand %p414_p6, %p408_p3 }
   0xf   :  { %418 = shalt.err (!%p415_p7)
}
  0x10   :  { %s446_s28 = smov 128   ;;  %s447_s29 = smov 8  }
  0x11   :  { %25 = dma.hbm_to_vmem [thread:$0]  %s548_s1, 256, %s20_s19, [#allocation3], %s446_s28, %s446_s28, %s447_s29  }
  0x12   :  { %441 = dma.done.wait [#allocation3], 256  }
  0x13   :  { %442 = vsyncadd [#allocation3], 4294967040  ;;  %vm48_vm0 = vcmask 130048   ;;  %v39_v0 = vld [vmem:[#allocation2] sm:$0xff]  ;;  %v40_v1 = vld [vmem:[#allocation2 + $0x8] sm:$0xff]  ;;  %vm157_vm1 = vcmask 261120  }
  0x14   :  { %v35_v2 = vld [vmem:[%s547_s0] sm:$0xff]  ;;  %v373_v3 = vpack.c.bf16 %v40_v1, %v39_v0  ;;  %v147_v5 = vld [vmem:[%s550_s3 + $0x8] sm:$0xff]  ;;  %v37_v8 = vld [vmem:[%s547_s0 + $0x10] sm:$0xff]  ;;  %vm299_vm2 = vcmask 64512  }
  0x15   :  { %353 = vmatprep.mubr.msk.f32.mxu0 %vm48_vm0, %v35_v2  ;;  %v146_v4 = vld [vmem:[%s550_s3] sm:$0xff]  ;;  %v36_v7 = vld [vmem:[%s547_s0 + $0x8] sm:$0xff]  ;;  %v38_v9 = vld [vmem:[%s547_s0 + $0x18] sm:$0xff] }
  0x16   :  { %374 = vmatprep.subr.bf16.mxu0 %v373_v3  ;;  %v377_v6 = vpack.c.bf16 %v147_v5, %v146_v4  ;;  %v148_v10 = vld [vmem:[%s550_s3 + $0x10] sm:$0xff]  ;;  %v149_v11 = vld [vmem:[%s550_s3 + $0x18] sm:$0xff]  ;;  %v321_v13 = vld [vmem:[%s549_s2] ss:$0 sm:$0xff]  ;;  %s448_s2 = smov [#allocation5]  }
  0x17   :  { %376 = vmatpush3.bf16.msra.mxu0 %v373_v3  ;;  %v381_v12 = vpack.c.bf16 %v149_v11, %v148_v10  ;;  %v326_v22 = vld [vmem:[%s551_s4] ss:$0 sm:$0xff]  ;;  %s309_s4 = sshll.u32 %s448_s2, 4  ;;  %s310_s4 = int_to_ptr.vmem [resolvable:$true] %s309_s4 }
  0x18   :  { %378 = vmatprep.subr.bf16.mxu1 %v377_v6  ;;  %s419_s24 = scalar_lea.vmem %s310_s4, 512  ;;  %p424_p9 = scmp.lt.s32.totalorder %s310_s4, %s310_s4 }
  0x19   :  { %380 = vmatpush3.bf16.msra.mxu1 %v377_v6  ;;  %p420_p8 = scmp.ne.s32.totalorder %s310_s4, %s419_s24  ;;  %p425_p10 = scmp.lt.s32.totalorder %s419_s24, %s419_s24 }
  0x1a   :  { %354 = vmatmul.mubr.msk.f32.vlgmr.msra.gmra.mrb[0].mxu0 %vm48_vm0, %v36_v7  ;;  %382 = vmatprep.subr.bf16.mxu1 %v381_v12 }
  0x1b   :  { %356 = vmatprep.mubr.msk.f32.mxu0 %vm48_vm0, %v37_v8  ;;  %p426_p11 = por %p425_p10, %p424_p9 }
  0x1d   :  { %384 = vmatpush3.bf16.msra.mxu1 %v381_v12  ;;  %p427_p12 = pnand %p426_p11, %p420_p8 }
  0x1e   :  { %357 = vmatmul.mubr.msk.f32.gmra.mrb[2].mxu0 %vm48_vm0, %v38_v9 }
  0xed   :  { %v355_v14 = vpop.f32.mrb[0].mxu0 }
  0xee   :  { %v127_v15 = vpop.f32.mrb[1].mxu0  ;;  %v133_v17 = vadd.f32 %v355_v14, %v321_v13 }
  0xef   :  { %v128_v16 = vadd.f32 %v321_v13, %v127_v15 }
  0xf1   :  { %v358_v18 = vpop.f32.mrb[2].mxu0  ;;  %367 = vmatprep.mubr.msk.f32.mxu1 %vm157_vm1, %v128_v16 }
  0xf2   :  { %v137_v19 = vpop.f32.mrb[3].mxu0  ;;  %368 = vmatmul.mubr.msk.f32.vlgmr.msra.gmra.mrb[0].mxu1 %vm157_vm1, %v133_v17  ;;  %v143_v21 = vadd.f32 %v358_v18, %v321_v13 }
  0xf3   :  { %v138_v20 = vadd.f32 %v321_v13, %v137_v19 }
  0xf5   :  { %370 = vmatprep.mubr.msk.f32.mxu1 %vm157_vm1, %v138_v20 }
  0xf6   :  { %371 = vmatmul.mubr.msk.f32.gmra.mrb[2].mxu1 %vm157_vm1, %v143_v21 }
 0x1c5   :  { %v369_v23 = vpop.f32.mrb[0].mxu1 }
 0x1c6   :  { %v242_v24 = vadd.f32 %v369_v23, %v326_v22  ;;  %v236_v25 = vpop.f32.mrb[1].mxu1 }
 0x1c7   :  { %v237_v26 = vadd.f32 %v326_v22, %v236_v25 }
 0x1c8   :  { %v256_v27 = vmin.f32 %v242_v24, 0.0  ;;  %vm292_vm4 = vcmp.gt.f32.partialorder %v242_v24, 0.0 }
 0x1c9   :  { %v255_v28 = vmin.f32 %v237_v26, 0.0  ;;  %v372_v29 = vpop.f32.mrb[2].mxu1  ;;  %vm291_vm6 = vcmp.gt.f32.partialorder %v237_v26, 0.0 }
 0x1ca   :  { %v277_v30 = vmul.f32 1.442695, %v256_v27  ;;  %v252_v31 = vadd.f32 %v372_v29, %v326_v22  ;;  %v246_v32 = vpop.f32.mrb[3].mxu1  ;;  %v264_v38 = vmul.f32 0.5, %v256_v27  ;;  %vm260_vm3 = vcmp.gt.f32.partialorder %v256_v27, -0.001953125 }
 0x1cb   :  { %v275_v33 = vmul.f32 1.442695, %v255_v28  ;;  %v247_v34 = vadd.f32 %v326_v22, %v246_v32  ;;  %v263_v40 = vmul.f32 0.5, %v255_v28  ;;  %vm259_vm5 = vcmp.gt.f32.partialorder %v255_v28, -0.001953125 }
 0x1cc   :  { %389 = vpow2.f32 %v277_v30  ;;  %v258_v35 = vmin.f32 %v252_v31, 0.0  ;;  %v268_v41 = vmul.f32 %v264_v38, %v256_v27  ;;  %vm294_vm8 = vcmp.gt.f32.partialorder %v252_v31, 0.0 }
 0x1cd   :  { %391 = vpow2.f32 %v275_v33  ;;  %v257_v36 = vmin.f32 %v247_v34, 0.0  ;;  %v267_v43 = vmul.f32 %v263_v40, %v255_v28  ;;  %vm293_vm10 = vcmp.gt.f32.partialorder %v247_v34, 0.0 }
 0x1ce   :  { %v281_v37 = vmul.f32 1.442695, %v258_v35  ;;  %v266_v42 = vmul.f32 0.5, %v258_v35  ;;  %v272_v47 = vadd.f32 %v268_v41, %v256_v27  ;;  %vm262_vm7 = vcmp.gt.f32.partialorder %v258_v35, -0.001953125 }
 0x1cf   :  { %v279_v39 = vmul.f32 1.442695, %v257_v36  ;;  %v265_v44 = vmul.f32 0.5, %v257_v36  ;;  %v271_v50 = vadd.f32 %v267_v43, %v255_v28  ;;  %vm261_vm9 = vcmp.gt.f32.partialorder %v257_v36, -0.001953125 }
 0x1d0   :  { %393 = vpow2.f32 %v281_v37  ;;  %v270_v49 = vmul.f32 %v266_v42, %v258_v35 }
 0x1d1   :  { %395 = vpow2.f32 %v279_v39  ;;  %v269_v52 = vmul.f32 %v265_v44, %v257_v36 }
 0x1d2   :  { %v274_v59 = vadd.f32 %v270_v49, %v258_v35 }
 0x1d3   :  { %v273_v61 = vadd.f32 %v269_v52, %v257_v36 }
 0x1d6   :  { %v390_v45 = vpop.eup %389 }
 0x1d7   :  { %v392_v46 = vpop.eup %391  ;;  %v332_v48 = vadd.f32 -1.0, %v390_v45 }
 0x1d8   :  { %v331_v51 = vadd.f32 -1.0, %v392_v46 }
 0x1d9   :  { %v288_v53 = vsel %vm260_vm3, %v272_v47, %v332_v48 }
 0x1da   :  { %v394_v54 = vpop.eup %393  ;;  %v296_v55 = vsel %vm292_vm4, %v242_v24, %v288_v53  ;;  %v287_v56 = vsel %vm259_vm5, %v271_v50, %v331_v51 }
 0x1db   :  { %v396_v57 = vpop.eup %395  ;;  %301 = vst.msk [vmem:[#allocation5 + $0x8] sm:$0xff] %vm299_vm2, %v296_v55  ;;  %v295_v58 = vsel %vm291_vm6, %v237_v26, %v287_v56  ;;  %v334_v60 = vadd.f32 -1.0, %v394_v54 }
 0x1dc   :  { %300 = vst.msk [vmem:[#allocation5] sm:$0xff] %vm299_vm2, %v295_v58  ;;  %v333_v62 = vadd.f32 -1.0, %v396_v57 }
 0x1dd   :  { %v290_v63 = vsel %vm262_vm7, %v274_v59, %v334_v60 }
 0x1de   :  { %v298_v0 = vsel %vm294_vm8, %v252_v31, %v290_v63  ;;  %v289_v1 = vsel %vm261_vm9, %v273_v61, %v333_v62 }
 0x1df   :  { %303 = vst.msk [vmem:[#allocation5 + $0x18] sm:$0xff] %vm299_vm2, %v298_v0  ;;  %v297_v2 = vsel %vm293_vm10, %v247_v34, %v289_v1 }
 0x1e0   :  { %302 = vst.msk [vmem:[#allocation5 + $0x10] sm:$0xff] %vm299_vm2, %v297_v2 }
 0x1e1   :  { %430 = shalt.err (!%p427_p12)
}
 0x1e2   :  { %s431_s27 = scalar_lea.hbm %s552_s5, 512 }
 0x1e3   :  { %p432_p13 = scmp.ne.s32.totalorder %s552_s5, %s431_s27  ;;  %p435_p0 = scmp.lt.u32.totalorder %s431_s27, %s552_s5 }
 0x1e5   :  { %p437_p1 = pnand %p435_p0, %p432_p13 }
 0x1e7   :  { %440 = shalt.err (!%p437_p1)
}
 0x1e8   :  { %315 = dma.vmem_to_hbm [thread:$0]  %s310_s4, 512, %s552_s5, [#allocation4], %s446_s28, %s446_s28, %s447_s29  }
 0x1e9   :  { %443 = dma.done.wait [#allocation4], 512  }
 0x1ea   :  { %444 = vsyncadd [#allocation4], 4294966784 }
 0x1eb   :  { %319 = vsyncpa [#allocation3], 1 }
 0x1ec   :  { %320 = vsyncpa [#allocation4], 1 }

</bundles_post_ra>
